<compile_context>
chip_gen: v7x
topology: tpu7x:2x2x1
jax: 0.10.0
libtpu: 0.0.40
codegen_flags: <defaults>
</compile_context>

<pallas_src>
import jax
import jax.numpy as jnp
from jax import lax
from jax.experimental import pallas as pl
from jax.experimental.pallas import tpu as pltpu

EPS = 1e-5          # nn.BatchNorm3d default eps
NUM_SPLITS = 2
_LANES = 128
_MAX_UNROLL_GROUPS = 8


# --------------------------------------------------------------------------
# Kernels
# --------------------------------------------------------------------------
def _stats_kernel(x_ref, sum_ref, sq_ref):
    # x_ref            : (npb_chunk, 1, C, tile_L)   one (chunk, split, L-tile) slab
    # sum_ref / sq_ref : (1, 1, C, 128)              partial accumulators, revisited
    #                                                across the (last) L-tile axis
    @pl.when(pl.program_id(2) == 0)
    def _():
        sum_ref[...] = jnp.zeros_like(sum_ref)
        sq_ref[...] = jnp.zeros_like(sq_ref)

    nb, _, c, tl = x_ref.shape
    k = tl // _LANES          # tile_L is always a multiple of 128 (wrapper pads L)

    def group(j):
        off = j * _LANES
        if not isinstance(off, int):
            off = pl.multiple_of(off, _LANES)
        xg = x_ref[:, :, :, pl.ds(off, _LANES)].astype(jnp.float32)
        xg = xg.reshape(nb, c, _LANES)                 # (nb, C, 128)
        return jnp.sum(xg, axis=0), jnp.sum(xg * xg, axis=0)

    s_acc, q_acc = group(0)
    if k <= _MAX_UNROLL_GROUPS:
        for j in range(1, k):                          # static unroll, aligned vreg adds
            s, q = group(j)
            s_acc = s_acc + s
            q_acc = q_acc + q
    else:
        def body(j, carry):                            # runtime loop for huge tiles
            s_c, q_c = carry
            s, q = group(j)
            return s_c + s, q_c + q
        s_acc, q_acc = lax.fori_loop(1, k, body, (s_acc, q_acc))

    sum_ref[...] += s_acc[None, None]
    sq_ref[...] += q_acc[None, None]


def _apply_kernel(x_ref, scale_ref, shift_ref, o_ref):
    # x_ref / o_ref         : (npb_chunk, 1, C, tile_L)
    # scale_ref / shift_ref : (1, C, 1)   precomputed per-(split, channel)
    c = x_ref.shape[2]
    scale = scale_ref[...].reshape(1, 1, c, 1)
    shift = shift_ref[...].reshape(1, 1, c, 1)
    o_ref[...] = (x_ref[...].astype(jnp.float32) * scale + shift).astype(o_ref.dtype)


# --------------------------------------------------------------------------
# Planning helpers
# --------------------------------------------------------------------------
def _round_up(v, m):
    return ((v + m - 1) // m) * m


def _divisors_desc(n):
    return sorted({d for i in range(1, int(n ** 0.5) + 1) if n % i == 0
                   for d in (i, n // i)}, reverse=True)


def _vmem_capacity_bytes():
    try:
        cap = int(getattr(pltpu.get_tpu_info(), "vmem_capacity_bytes", 0))
    except Exception:
        cap = 0
    return cap if cap > 0 else (64 << 20)      # conservative (v7x-sized) fallback


def _plan_tiles(L, npb, c, num_splits, itemsize, budget_bytes):
    """Pick (L_padded, tile_l, npb_chunk) targeting `budget_bytes` per block."""
    lp = _round_up(L, _LANES)
    lane_tiles = [t for t in range(_LANES, lp + 1, _LANES) if lp % t == 0]

    def best_tile_l(nb_chunk):
        row_bytes = max(1, nb_chunk * c * itemsize)
        best = None
        for t in lane_tiles:
            if t * row_bytes <= budget_bytes:
                best = t
        return best

    target_min_tl = min(512, lp)     # keep per-row DMA runs >= ~2 KiB
    npb_chunk, tile_l = npb, best_tile_l(npb)
    if tile_l is None or tile_l < target_min_tl:
        # Shrink batch-rows-per-block instead of the lane tile.
        for nb in _divisors_desc(npb):
            t = best_tile_l(nb)
            if t is not None and t >= target_min_tl:
                npb_chunk, tile_l = nb, t
                break
        else:
            npb_chunk = 1
            tile_l = best_tile_l(1) or _LANES

    # Megacore (v7x): ensure >=2-way parallel grid work in phase 1 when the
    # split axis alone cannot provide it.
    if num_splits == 1 and npb // npb_chunk == 1 and npb > 1:
        npb_chunk = max(d for d in _divisors_desc(npb) if d < npb)
    return lp, tile_l, npb_chunk


def _block_spec(block_shape, index_map, buffers=None):
    if buffers is not None and buffers != 2 and hasattr(pl, "Buffered"):
        try:
            return pl.BlockSpec(block_shape, index_map,
                                pipeline_mode=pl.Buffered(buffers))
        except TypeError:
            pass
    return pl.BlockSpec(block_shape, index_map)


# --------------------------------------------------------------------------
# Wrapper
# --------------------------------------------------------------------------
def sub_batch_norm_3d(x, weight, bias, num_splits=NUM_SPLITS, *,
                      eps=EPS, tile_l=None, npb_chunk=None,
                      block_budget_bytes=None, phase1_input_buffers=2):
    n, c, t, h, w = x.shape
    assert n % num_splits == 0, "batch must be divisible by num_splits"
    assert weight.shape == (c,) and bias.shape == (c,)
    npb = n // num_splits
    L = t * h * w
    itemsize = x.dtype.itemsize

    # Generation-aware budgets.
    vmem_cap = _vmem_capacity_bytes()
    if block_budget_bytes is None:
        block_budget_bytes = (4 << 20) if vmem_cap <= (64 << 20) else (8 << 20)

    lp, auto_tl, auto_nb = _plan_tiles(L, npb, c, num_splits, itemsize,
                                       block_budget_bytes)
    if tile_l is None:
        tile_l = auto_tl
    if npb_chunk is None:
        npb_chunk = auto_nb
    assert tile_l % _LANES == 0 and lp % tile_l == 0
    assert npb % npb_chunk == 0
    n_lt = lp // tile_l
    n_nb = npb // npb_chunk

    # matches torch's x.view(n // num_splits, num_splits * c, t, h, w):
    # split index = batch index mod num_splits within each group of num_splits.
    xr = x.reshape(npb, num_splits, c, L)
    if lp != L:
        # Zero pad: contributes nothing to sum / sum-of-squares; cnt stays npb*L.
        xr = jnp.pad(xr, ((0, 0), (0, 0), (0, 0), (0, lp - L)))

    block_bytes = npb_chunk * c * tile_l * itemsize
    # <= 0.75x physical VMEM; phase 2 double-buffers in+out (~4x block) plus
    # an f32 temporary; phase 1 is lighter.
    vmem_limit = int(min(int(0.75 * vmem_cap),
                         max(16 << 20, 8 * block_bytes)))

    x_spec = pl.BlockSpec((npb_chunk, 1, c, tile_l),
                          lambda s, nb, lt: (nb, s, 0, lt))
    x_spec_p1 = _block_spec((npb_chunk, 1, c, tile_l),
                            lambda s, nb, lt: (nb, s, 0, lt),
                            buffers=phase1_input_buffers)
    acc_spec = pl.BlockSpec((1, 1, c, _LANES), lambda s, nb, lt: (nb, s, 0, 0))
    param_spec = pl.BlockSpec((1, c, 1), lambda s, nb, lt: (s, 0, 0))

    # ---- Phase 1: per-(chunk, split, channel) sum / sum-of-squares ---------
    acc_shape = (n_nb, num_splits, c, _LANES)
    cost1 = pl.CostEstimate(
        flops=3 * xr.size, transcendentals=0,
        bytes_accessed=xr.nbytes + 2 * n_nb * num_splits * c * _LANES * 4)
    part_sum, part_sq = pl.pallas_call(
        _stats_kernel,
        out_shape=(jax.ShapeDtypeStruct(acc_shape, jnp.float32),
                   jax.ShapeDtypeStruct(acc_shape, jnp.float32)),
        grid_spec=pltpu.PrefetchScalarGridSpec(
            num_scalar_prefetch=0,
            grid=(num_splits, n_nb, n_lt),
            in_specs=[x_spec_p1],
            out_specs=(acc_spec, acc_spec)),
        compiler_params=pltpu.CompilerParams(
            dimension_semantics=("parallel", "parallel", "arbitrary"),
            vmem_limit_bytes=vmem_limit),
        cost_estimate=cost1,
    )(xr)

    # ---- tiny glue: biased stats -> per-(split, channel) scale / shift -----
    cnt = jnp.float32(npb * L)                          # exact count (no pad)
    sum_c = jnp.sum(part_sum, axis=(0, 3))              # (S, C)
    sq_c = jnp.sum(part_sq, axis=(0, 3))                # (S, C)
    mean = sum_c / cnt
    var = jnp.maximum(sq_c / cnt - mean * mean, 0.0)    # biased, clamped
    inv = lax.rsqrt(var + eps)
    scale = weight.astype(jnp.float32)[None, :] * inv   # (S, C)
    shift = bias.astype(jnp.float32)[None, :] - mean * scale
    scale = scale.reshape(num_splits, c, 1)
    shift = shift.reshape(num_splits, c, 1)

    # ---- Phase 2: fully parallel normalize sweep (writes in place) ---------
    cost2 = pl.CostEstimate(flops=2 * xr.size, transcendentals=0,
                            bytes_accessed=2 * xr.nbytes)
    out = pl.pallas_call(
        _apply_kernel,
        out_shape=jax.ShapeDtypeStruct(xr.shape, x.dtype),
        grid_spec=pltpu.PrefetchScalarGridSpec(
            num_scalar_prefetch=0,
            grid=(num_splits, n_nb, n_lt),
            in_specs=[x_spec, param_spec, param_spec],
            out_specs=x_spec),
        compiler_params=pltpu.CompilerParams(
            dimension_semantics=("parallel", "parallel", "parallel"),
            vmem_limit_bytes=vmem_limit),
        cost_estimate=cost2,
        input_output_aliases={0: 0},     # reuse the (reshaped/padded) x buffer
    )(xr, scale, shift)

    if lp != L:
        out = out[..., :L]
    return out.reshape(n, c, t, h, w)


# --------------------------------------------------------------------------
# Pure-JAX reference (mirrors PyTorch training-mode forward, two-pass stats)
# --------------------------------------------------------------------------
def _reference(x, weight, bias, num_splits=NUM_SPLITS, eps=EPS):
    n, c, t, h, w = x.shape
    xr = x.reshape(n // num_splits, num_splits * c, t, h, w)
    mean = xr.mean(axis=(0, 2, 3, 4), keepdims=True)
    var = ((xr - mean) ** 2).mean(axis=(0, 2, 3, 4), keepdims=True)
    xn = ((xr - mean) / jnp.sqrt(var + eps)).reshape(n, c, t, h, w)
    return xn * weight.reshape(-1, 1, 1, 1) + bias.reshape(-1, 1, 1, 1)


# TODO(synk): running-stats updates (split_bn.running_mean/var) and eval-mode
# aggregate_stats are stateful buffer bookkeeping outside the training forward
# output and are not implemented in the kernel.

if __name__ == "__main__":
    key = jax.random.PRNGKey(0)
    kx, kw, kb, kx2, kw2, kb2 = jax.random.split(key, 6)

    # Case 1: L multiple of 128, num_splits=2. Auto-tiled run exercises the
    # fori_loop lane-group fold (L=2048 -> 16 groups); forced-small-tile run
    # exercises the multi-L-tile accumulation and npb-chunk parallel paths.
    N, C, T, H, W = 4, 8, 4, 8, 64          # L = 2048
    x = jax.random.normal(kx, (N, C, T, H, W), dtype=jnp.float32)
    weight = 1.0 + 0.1 * jax.random.normal(kw, (C,), dtype=jnp.float32)
    bias = 0.1 * jax.random.normal(kb, (C,), dtype=jnp.float32)
    ref = _reference(x, weight, bias, NUM_SPLITS)

    out = jax.block_until_ready(sub_batch_norm_3d(x, weight, bias, NUM_SPLITS))
    assert out.shape == ref.shape
    assert jnp.allclose(out, ref, atol=5e-4, rtol=5e-4), "mismatch (auto tiles)"

    out2 = jax.block_until_ready(
        sub_batch_norm_3d(x, weight, bias, NUM_SPLITS, tile_l=128, npb_chunk=1))
    assert jnp.allclose(out2, ref, atol=5e-4, rtol=5e-4), "mismatch (forced tiles)"

    # Case 2: L % 128 != 0 (zero-pad path), C not a multiple of 8,
    # num_splits=1 (exercises the megacore npb-chunk split).
    N2, C2, T2, H2, W2 = 2, 5, 2, 7, 14     # L = 196 -> padded to 256
    xb = jax.random.normal(kx2, (N2, C2, T2, H2, W2), dtype=jnp.float32)
    wb = 1.0 + 0.1 * jax.random.normal(kw2, (C2,), dtype=jnp.float32)
    bb = 0.1 * jax.random.normal(kb2, (C2,), dtype=jnp.float32)
    refb = _reference(xb, wb, bb, 1)
    outb = jax.block_until_ready(sub_batch_norm_3d(xb, wb, bb, 1))
    assert jnp.allclose(outb, refb, atol=5e-4, rtol=5e-4), "mismatch (pad path)"

    print("KERNEL_OK")
</pallas_src>

<mosaic_0001>
module attributes {stable_mosaic.version = 11 : i64} {
  func.func @_stats_kernel(%arg0: i32, %arg1: i32, %arg2: i32, %arg3: memref<2x1x8x2048xf32, #tpu.memory_space<vmem>>, %arg4: memref<1x1x8x128xf32, #tpu.memory_space<vmem>>, %arg5: memref<1x1x8x128xf32, #tpu.memory_space<vmem>>) attributes {dimension_semantics = [#tpu.dimension_semantics<parallel>, #tpu.dimension_semantics<parallel>, #tpu.dimension_semantics<arbitrary>], iteration_bounds = array<i64: 2, 1, 1>, scalar_prefetch = 0 : i64, scratch_operands = 0 : i64, tpu.core_type = #tpu.core_type<tc>, window_params = [{transform_indices = @transform_0, window_bounds = array<i64: 2, 1, 8, 2048>}, {transform_indices = @transform_1, window_bounds = array<i64: 1, 1, 8, 128>}, {transform_indices = @transform_2, window_bounds = array<i64: 1, 1, 8, 128>}]} {
    %c0_i32 = arith.constant 0 : i32
    %0 = arith.cmpi eq, %arg2, %c0_i32 : i32
    %1 = arith.extui %0 : i1 to i32
    %c0_i32_0 = arith.constant 0 : i32
    %2 = arith.cmpi ne, %1, %c0_i32_0 : i32
    scf.if %2 {
      %cst_23 = arith.constant 0.000000e+00 : f32
      %18 = vector.broadcast %cst_23 : f32 to vector<1x1x8x128xf32>
      %c0_24 = arith.constant 0 : index
      %c0_25 = arith.constant 0 : index
      %c0_26 = arith.constant 0 : index
      %c0_27 = arith.constant 0 : index
      %19 = vector.load %arg4[%c0_24, %c0_25, %c0_26, %c0_27] : memref<1x1x8x128xf32, #tpu.memory_space<vmem>>, vector<1x1x8x128xf32>
      tpu.vector_store %arg4[%c0_24, %c0_25, %c0_26, %c0_27], %18 {strides = array<i32>} : memref<1x1x8x128xf32, #tpu.memory_space<vmem>>, vector<1x1x8x128xf32>,
      %cst_28 = arith.constant 0.000000e+00 : f32
      %20 = vector.broadcast %cst_28 : f32 to vector<1x1x8x128xf32>
      %c0_29 = arith.constant 0 : index
      %c0_30 = arith.constant 0 : index
      %c0_31 = arith.constant 0 : index
      %c0_32 = arith.constant 0 : index
      %21 = vector.load %arg5[%c0_29, %c0_30, %c0_31, %c0_32] : memref<1x1x8x128xf32, #tpu.memory_space<vmem>>, vector<1x1x8x128xf32>
      tpu.vector_store %arg5[%c0_29, %c0_30, %c0_31, %c0_32], %20 {strides = array<i32>} : memref<1x1x8x128xf32, #tpu.memory_space<vmem>>, vector<1x1x8x128xf32>,
    } else {
    }
    %c0 = arith.constant 0 : index
    %c0_1 = arith.constant 0 : index
    %c0_2 = arith.constant 0 : index
    %c0_3 = arith.constant 0 : index
    %3 = vector.load %arg3[%c0, %c0_1, %c0_2, %c0_3] : memref<2x1x8x2048xf32, #tpu.memory_space<vmem>>, vector<2x1x8x128xf32>
    %4 = vector.shape_cast %3 : vector<2x1x8x128xf32> to vector<2x8x128xf32>
    %cst = arith.constant dense<0.000000e+00> : vector<8x128xf32>
    %5 = vector.multi_reduction <add>, %4, %cst [0] : vector<2x8x128xf32> to vector<8x128xf32>
    %6 = arith.mulf %4, %4 : vector<2x8x128xf32>
    %cst_4 = arith.constant dense<0.000000e+00> : vector<8x128xf32>
    %7 = vector.multi_reduction <add>, %6, %cst_4 [0] : vector<2x8x128xf32> to vector<8x128xf32>
    %c1_i32 = arith.constant 1 : i32
    %c15_i32 = arith.constant 15 : i32
    %8 = arith.addi %c1_i32, %c15_i32 : i32
    %c1_i32_5 = arith.constant 1 : i32
    %9:2 = scf.for %arg6 = %c1_i32 to %8 step %c1_i32_5 iter_args(%arg7 = %5, %arg8 = %7) -> (vector<8x128xf32>, vector<8x128xf32>)  : i32 {
      %c128_i32 = arith.constant 128 : i32
      %18 = arith.muli %arg6, %c128_i32 : i32
      %19 = tpu.assume_multiple %18, 128 : i32
      %c0_23 = arith.constant 0 : index
      %c0_24 = arith.constant 0 : index
      %c0_25 = arith.constant 0 : index
      %20 = arith.index_cast %19 : i32 to index
      %21 = vector.load %arg3[%c0_23, %c0_24, %c0_25, %20] : memref<2x1x8x2048xf32, #tpu.memory_space<vmem>>, vector<2x1x8x128xf32>
      %22 = vector.shape_cast %21 : vector<2x1x8x128xf32> to vector<2x8x128xf32>
      %cst_26 = arith.constant dense<0.000000e+00> : vector<8x128xf32>
      %23 = vector.multi_reduction <add>, %22, %cst_26 [0] : vector<2x8x128xf32> to vector<8x128xf32>
      %24 = arith.mulf %22, %22 : vector<2x8x128xf32>
      %cst_27 = arith.constant dense<0.000000e+00> : vector<8x128xf32>
      %25 = vector.multi_reduction <add>, %24, %cst_27 [0] : vector<2x8x128xf32> to vector<8x128xf32>
      %26 = arith.addf %arg7, %23 : vector<8x128xf32>
      %27 = arith.addf %arg8, %25 : vector<8x128xf32>
      scf.yield %26, %27 : vector<8x128xf32>, vector<8x128xf32>
    }
    %c15_i32_6 = arith.constant 15 : i32
    %c0_7 = arith.constant 0 : index
    %c0_8 = arith.constant 0 : index
    %c0_9 = arith.constant 0 : index
    %c0_10 = arith.constant 0 : index
    %10 = vector.load %arg4[%c0_7, %c0_8, %c0_9, %c0_10] : memref<1x1x8x128xf32, #tpu.memory_space<vmem>>, vector<1x1x8x128xf32>
    %11 = vector.shape_cast %9#0 : vector<8x128xf32> to vector<1x1x8x128xf32>
    %12 = arith.addf %10, %11 : vector<1x1x8x128xf32>
    %c0_11 = arith.constant 0 : index
    %c0_12 = arith.constant 0 : index
    %c0_13 = arith.constant 0 : index
    %c0_14 = arith.constant 0 : index
    %13 = vector.load %arg4[%c0_11, %c0_12, %c0_13, %c0_14] : memref<1x1x8x128xf32, #tpu.memory_space<vmem>>, vector<1x1x8x128xf32>
    tpu.vector_store %arg4[%c0_11, %c0_12, %c0_13, %c0_14], %12 {strides = array<i32>} : memref<1x1x8x128xf32, #tpu.memory_space<vmem>>, vector<1x1x8x128xf32>,
    %c0_15 = arith.constant 0 : index
    %c0_16 = arith.constant 0 : index
    %c0_17 = arith.constant 0 : index
    %c0_18 = arith.constant 0 : index
    %14 = vector.load %arg5[%c0_15, %c0_16, %c0_17, %c0_18] : memref<1x1x8x128xf32, #tpu.memory_space<vmem>>, vector<1x1x8x128xf32>
    %15 = vector.shape_cast %9#1 : vector<8x128xf32> to vector<1x1x8x128xf32>
    %16 = arith.addf %14, %15 : vector<1x1x8x128xf32>
    %c0_19 = arith.constant 0 : index
    %c0_20 = arith.constant 0 : index
    %c0_21 = arith.constant 0 : index
    %c0_22 = arith.constant 0 : index
    %17 = vector.load %arg5[%c0_19, %c0_20, %c0_21, %c0_22] : memref<1x1x8x128xf32, #tpu.memory_space<vmem>>, vector<1x1x8x128xf32>
    tpu.vector_store %arg5[%c0_19, %c0_20, %c0_21, %c0_22], %16 {strides = array<i32>} : memref<1x1x8x128xf32, #tpu.memory_space<vmem>>, vector<1x1x8x128xf32>,
    return
  }
  func.func @transform_0(%arg0: i32, %arg1: i32, %arg2: i32) -> (i32, i32, i32, i32) {
    %c0_i32 = arith.constant 0 : i32
    %c0_i32_0 = arith.constant 0 : i32
    return %arg1, %arg0, %c0_i32, %arg2 : i32, i32, i32, i32
  }
  func.func @transform_1(%arg0: i32, %arg1: i32, %arg2: i32) -> (i32, i32, i32, i32) {
    %c0_i32 = arith.constant 0 : i32
    %c0_i32_0 = arith.constant 0 : i32
    %c0_i32_1 = arith.constant 0 : i32
    return %arg1, %arg0, %c0_i32, %c0_i32_0 : i32, i32, i32, i32
  }
  func.func @transform_2(%arg0: i32, %arg1: i32, %arg2: i32) -> (i32, i32, i32, i32) {
    %c0_i32 = arith.constant 0 : i32
    %c0_i32_0 = arith.constant 0 : i32
    %c0_i32_1 = arith.constant 0 : i32
    return %arg1, %arg0, %c0_i32, %c0_i32_0 : i32, i32, i32, i32
  }
}

</mosaic_0001>

<bundles_post_ra>
// kernel: tpu_custom_call.1
= control target key start
LH: loop header
LB: loop body
LE: loop exit
PB: predicated region body
PF: predicated region fallthrough
CT: control target
= control target key end

     0   :  { %8 = vsyncpa [#allocation3], 0  ;;  %s938_s0 = inlined_call_operand.hbm [shape: f32[2,2,8,2048], index: 0, kind: input, shape index: {}]   ;;  %s939_s1 = inlined_call_operand.hbm [shape: f32[1,2,8,128], index: 1, kind: output, shape index: {0}]   ;;  %s940_s2 = inlined_call_operand.hbm [shape: f32[1,2,8,128], index: 2, kind: output, shape index: {1}]  }
   0x1   :  { %10 = vsyncpa [#allocation3 + $0x1], 0 }
   0x2   :  { %11 = vsyncpa [#allocation4], 0 }
   0x3   :  { %13 = vsyncpa [#allocation4 + $0x1], 0 }
   0x4   :  { %14 = vsyncpa [#allocation7], 0 }
   0x5   :  { %16 = vsyncpa [#allocation7 + $0x1], 0  ;;  %s724_s9 = smov 0   ;;  %s726_s10 = smov 0  }
   0x6   :  { %s728_s11 = smov 0   ;;  %s730_s12 = smov 0  }
   0x7   :  { %s732_s13 = smov 0   ;;  %s734_s14 = smov 0  }
   0x8 LB: > { %s417_s15 = sadd.s32 4294967295, %s688_s14   ;;  %s418_s16 = sadd.s32 4294967294, %s688_s14   ;;  %s688_s14 = sphi %s734_s14, %s22_s14   ;;  %s684_s13 = sphi %s732_s13, %s954_s13   ;;  %s680_s12 = sphi %s730_s12, %s953_s12   ;;  %s676_s11 = sphi %s728_s11, %s952_s11   ;;  %s672_s10 = sphi %s726_s10, %s951_s10   ;;  %s668_s9 = sphi %s724_s9, %s950_s9  }
   0x9   : > { %s41_s17 = sadd.s32 1, %s684_s13  ;;  %s52_s18 = sadd.s32 1, %s676_s11 }
   0xa   : > { %p43_p0 = scmp.ge.s32.totalorder %s41_s17, 2  ;;  %p59_p1 = scmp.ne.s32.totalorder %s676_s11, %s672_s10 }
   0xb   : > { %p60_p2 = scmp.eq.s32.totalorder %s688_s14, 0  ;;  %p65_p3 = scmp.ne.s32.totalorder %s672_s10, %s668_s9 }
   0xc   : > { %s956_s17 = smov (%p43_p0, %s41_s17), 0  ;;  %p66_p5 = scmp.eq.s32.totalorder %s417_s15, 0 }
   0xd   : > { %p765_p4 = por %p60_p2, %p59_p1  ;;  %s46_s20 = ssub.s32 %s684_s13, %s956_s17 }
   0xe   : > { %p91_p6 = scmp.eq.s32.totalorder %s417_s15, 1  ;;  %p50_p7 = scmp.eq.s32.totalorder %s46_s20, 0 }
   0xf   : > { %p771_p8 = por %p66_p5, %p65_p3  ;;  %p97_p10 = scmp.eq.s32.totalorder %s418_s16, 1 }
  0x10   : > { %p775_p9 = por %p91_p6, %p59_p1  ;;  %p454_p13 = scmp.lt.s32.totalorder %s688_s14, 2 }
  0x11   : > { %s780_s23 = scalar_select %p50_p7, %s676_s11, %s52_s18  }
  0x12   : > { %s944_s22 = scalar_select %p775_p9, 1, 0 }
  0x13   : > { %p782_p11 = por %p97_p10, %p65_p3  ;;  %s145_s25 = sand.u32 1, %s676_s11  }
  0x14   : > { %s421_s26 = sshll.u32 %s145_s25, 8  ;;  %s436_s27 = sshll.u32 %s684_s13, 11 }
  0x15   : > { %s945_s24 = scalar_select %p782_p11, 1, 0 }
  0x16   : > { %s793_s30 = scalar_lea.hbm %s938_s0, %s436_s27  ;;  %s149_s3 = scalar_lea.vmem [#allocation2], %s421_s26 }
  0x17   : > { %s161_s4 = sshll.u32 %s149_s3, 4  ;;  %p799_p0 = pnand %p454_p13, %p765_p4  ;;  %s795_s4 = int_to_ptr.vmem [resolvable:$true] %s161_s4 }
  0x18   : > { %s803_s6 = scalar_lea.sflag [#allocation3], %s145_s25  ;;  %s532_s7 = scalar_lea.hbm %s793_s30, 4096 }
  0x19   : > { %p533_p1 = scmp.ne.s32.totalorder %s793_s30, %s532_s7  ;;  %p534_p2 = pneg %p799_p0 }
  0x1a   : > { %s537_s16 = scalar_lea.hbm %s938_s0, 8192  ;;  %p538_p4 = scmp.lt.u32.totalorder %s793_s30, %s938_s0 }
  0x1b   : > { %p535_p3 = pnand %p534_p2, %p533_p1  ;;  %p539_p6 = scmp.lt.u32.totalorder %s537_s16, %s532_s7 }
  0x1c   : > { %p541_p10 = scmp.lt.u32.totalorder %s532_s7, %s793_s30 }
  0x1d   : > { %p536_p5 = pneg %p535_p3  ;;  %p540_p7 = por %p539_p6, %p538_p4 }
  0x1f   : > { %p542_p13 = por %p541_p10, %p540_p7 }
  0x21   : > { %p543_p12 = pnand %p542_p13, %p536_p5 }
  0x23   : > { %546 = shalt.err (!%p543_p12)
}
  0x24   : > { %s547_s20 = scalar_lea.vmem %s795_s4, 4096  ;;  %s702_s25 = smov [#allocation2]  }
  0x25   : > { %p548_p1 = scmp.ne.s32.totalorder %s795_s4, %s547_s20  ;;  %s552_s26 = sshll.u32 %s702_s25, 4  ;;  %s553_s26 = int_to_ptr.vmem [resolvable:$false] %s552_s26 }
  0x26   : > { %s554_s27 = scalar_lea.vmem %s553_s26, 8192  ;;  %p555_p9 = scmp.lt.s32.totalorder %s795_s4, %s553_s26 }
  0x27   : > { %p550_p3 = pnand %p548_p1, %p534_p2  ;;  %p556_p4 = scmp.lt.s32.totalorder %s554_s27, %s547_s20 }
  0x29   : > { %p551_p11 = pneg %p550_p3  ;;  %p557_p6 = por %p556_p4, %p555_p9 }
  0x2b   : > { %p558_p7 = pnand %p557_p6, %p551_p11 }
  0x2d   : > { %561 = shalt.err (!%p558_p7)
}
  0x2e   : > { %s703_s28 = smov 4096   ;;  %s704_s29 = smov 2048  }
  0x2f   : > { %s705_s3 = smov 128   ;;  %p424_p12 = scmp.ge.s32.totalorder %s688_s14, 1 }
  0x30   : > { %446 = dma.hbm_to_vmem [thread:$0]  (!%p799_p0), %s793_s30, 4096, %s795_s4, %s803_s6, %s703_s28, %s704_s29, %s705_s3  }
  0x31   : > { %p169_p2 = scmp.lt.s32.totalorder %s688_s14, 3 }
  0x33   : > { %p170_p5 = pnand %p424_p12, %p169_p2 }
  0x34   : > { %s834_s7 = sand.u32 (!%p170_p5), 1, %s672_s10  }
  0x35   : > { %173 = sbr.rel (%p170_p5) target bundleno = 121 (0x79), region = 24  ;;  %s425_s8 = sshll.u32 (!%p170_p5), %s834_s7, 8 }
  0x36   : > { %s176_s15 = scalar_lea.sflag (!%p170_p5), [#allocation3], %s834_s7  ;;  %s838_s16 = scalar_lea.vmem (!%p170_p5), [#allocation2], %s425_s8 }
  0x3c   : > { %655 = dma.done.wait (%p771_p8), %s176_s15, 4096  }
  0x3d   : > { %657 = vsyncadd (%p771_p8), %s176_s15, 4294963200  ;;  %s426_s30 = sshll.u32 %s834_s7, 3  ;;  %v706_v0 = vmov 0.0   ;;  %v213_v1 = vld [vmem:[%s838_s16] sm:$0xff]  ;;  %s698_s21 = smov 1  }
  0x3e   : > { %s845_s4 = scalar_lea.vmem [#allocation5], %s426_s30  ;;  %s848_s5 = scalar_lea.vmem [#allocation6], %s426_s30  ;;  %v214_v2 = vld [vmem:[%s838_s16 + $0x80] sm:$0xff]  ;;  %v216_v4 = vmul.f32 %v213_v1, %v213_v1 }
  0x3f   : > { %211 = vst [vmem:[%s845_s4] sm:$0xff] %v706_v0  ;;  %212 = vst [vmem:[%s848_s5] sm:$0xff] %v706_v0  ;;  %v215_v3 = vadd.f32 %v214_v2, %v213_v1   ;;  %v217_v5 = vmul.f32 %v214_v2, %v214_v2 }
  0x41   : > { %v218_v6 = vadd.f32 %v217_v5, %v216_v4   ;;  %v694_v8 = vmov %v215_v3  }
  0x43   : > { %v690_v7 = vmov %v218_v6  }
  0x44 LB: >> { %s428_s6 = sshll.u32 %s700_s21, 7  ;;  %s224_s21 = sadd.s32 1, %s700_s21   ;;  %s700_s21 = sphi %s698_s21, %s224_s21   ;;  %v696_v8 = vphi %v694_v8, %v695_v8   ;;  %v692_v7 = vphi %v690_v7, %v691_v7  }
  0x45   : >> { %s228_s18 = sshra.s32 %s428_s6, 7  ;;  %p221_p8 = scmp.ge.s32.totalorder %s224_s21, 16  }
  0x46   : >> { %s429_s19 = sshll.u32 %s228_s18, 3  ;;  %v240_v17 = vld [vmem:[%s845_s4] sm:$0xff] (%p221_p8)  ;;  %v243_v18 = vld [vmem:[%s848_s5] sm:$0xff] (%p221_p8)  ;;  %s432_s25 = sshll.u32 (%p221_p8), %s680_s12, 7 }
  0x47   : >> { %s231_s20 = scalar_lea.vmem %s838_s16, %s429_s19 [#allocation2]  ;;  %s860_s28 = scalar_lea.hbm (%p221_p8), %s939_s1, %s432_s25 }
  0x48   : >> { %v232_v9 = vld [vmem:[%s231_s20] sm:$0xff]  ;;  %s267_s29 = sshll.u32 (%p221_p8), %s845_s4, 4  ;;  %s870_s15 = scalar_lea.hbm (%p221_p8), %s940_s2, %s432_s25  ;;  %s863_s29 = int_to_ptr.vmem [resolvable:$true] %s267_s29 }
  0x49   : >> { %v233_v10 = vld [vmem:[%s231_s20 + $0x80] sm:$0xff]  ;;  %v235_v12 = vmul.f32 %v232_v9, %v232_v9  ;;  %s282_s12 = sshll.u32 (%p221_p8), %s848_s5, 4  ;;  %s247_s16 = scalar_lea.sflag (%p221_p8), [#allocation4], %s834_s7  ;;  %s283_s12 = int_to_ptr.vmem [resolvable:$true] %s282_s12 }
  0x4a   : >> { %v234_v11 = vadd.f32 %v233_v10, %v232_v9  ;;  %v236_v13 = vmul.f32 %v233_v10, %v233_v10  ;;  %223 = sbr.rel (!%p221_p8) target bundleno = 68 (0x44), region = 98  ;;  %s562_s30 = scalar_lea.vmem (%p221_p8), %s863_s29, 128 }
  0x4b   : > { %p563_p9 = scmp.ne.s32.totalorder (%p221_p8), %s863_s29, %s562_s30  ;;  %p947_p11 = scmp.ne.s32.totalorder (%p221_p8), %s944_s22, 0 }
  0x4c   : >> { %v237_v14 = vadd.f32 %v236_v13, %v235_v12  ;;  %v238_v15 = vadd.f32 %v696_v8, %v234_v11   ;;  %s707_s21 = smov (%p221_p8), [#allocation5]  }
  0x4d   : > { %p564_p0 = pnand (%p221_p8), %p563_p9, %p947_p11  ;;  %s566_s6 = sshll.u32 (%p221_p8), %s707_s21, 4  ;;  %s567_s6 = int_to_ptr.vmem [resolvable:$false] %s566_s6 }
  0x4e   : >> { %v239_v16 = vadd.f32 %v692_v7, %v237_v14   ;;  %v695_v8 = vmov %v238_v15   ;;  %v241_v19 = vadd.f32 (%p221_p8), %v240_v17, %v238_v15  ;;  %s568_s18 = scalar_lea.vmem (%p221_p8), %s567_s6, 256  ;;  %p569_p13 = scmp.lt.s32.totalorder (%p221_p8), %s863_s29, %s567_s6 }
  0x4f   : > { %p565_p10 = pneg (%p221_p8), %p564_p0  ;;  %p570_p1 = scmp.lt.s32.totalorder (%p221_p8), %s568_s18, %s562_s30 }
  0x50   : >> { %v691_v7 = vmov %v239_v16   ;;  %v244_v20 = vadd.f32 (%p221_p8), %v243_v18, %v239_v16  ;;  %242 = vst [vmem:[%s845_s4] sm:$0xff] (%p221_p8), %v241_v19 }
  0x51   : > { %p571_p3 = por %p570_p1, %p569_p13 }
  0x52   : > { %245 = vst [vmem:[%s848_s5] sm:$0xff] %v244_v20 }
  0x53   : > { %p572_p4 = pnand %p571_p3, %p565_p10 }
  0x55   : > { %575 = shalt.err (!%p572_p4)
}
  0x56   : > { %s576_s4 = scalar_lea.hbm %s860_s28, 128  ;;  %s580_s25 = scalar_lea.hbm %s939_s1, 256 }
  0x57   : > { %p577_p6 = scmp.ne.s32.totalorder %s860_s28, %s576_s4  ;;  %p581_p2 = scmp.lt.u32.totalorder %s860_s28, %s939_s1 }
  0x58   : > { %p582_p5 = scmp.lt.u32.totalorder %s580_s25, %s576_s4  ;;  %p584_p9 = scmp.lt.u32.totalorder %s576_s4, %s860_s28 }
  0x59   : > { %p578_p7 = pnand %p577_p6, %p947_p11 }
  0x5a   : > { %p583_p8 = por %p582_p5, %p581_p2 }
  0x5b   : > { %p579_p12 = pneg %p578_p7 }
  0x5c   : > { %p585_p0 = por %p584_p9, %p583_p8 }
  0x5e   : > { %p586_p10 = pnand %p585_p0, %p579_p12 }
  0x60   : > { %589 = shalt.err (!%p586_p10)
}
  0x61   : > { %439 = dma.vmem_to_hbm [thread:$0]  (%p947_p11), %s863_s29, 128, %s860_s28, %s247_s16  }
  0x62   : > { %s252_s3 = scalar_lea.sflag [#allocation7], %s834_s7  ;;  %s590_s8 = scalar_lea.vmem %s283_s12, 128 }
  0x63   : > { %p591_p13 = scmp.ne.s32.totalorder %s283_s12, %s590_s8  ;;  %s708_s30 = smov [#allocation6]  }
  0x64   : > { %s594_s21 = sshll.u32 %s708_s30, 4  ;;  %s595_s21 = int_to_ptr.vmem [resolvable:$false] %s594_s21 }
  0x65   : > { %p592_p1 = pnand %p591_p13, %p947_p11  ;;  %s596_s6 = scalar_lea.vmem %s595_s21, 256 }
  0x66   : > { %p597_p4 = scmp.lt.s32.totalorder %s283_s12, %s595_s21  ;;  %p598_p6 = scmp.lt.s32.totalorder %s596_s6, %s590_s8 }
  0x67   : > { %p593_p3 = pneg %p592_p1 }
  0x68   : > { %p599_p7 = por %p598_p6, %p597_p4 }
  0x6a   : > { %p600_p12 = pnand %p599_p7, %p593_p3 }
  0x6c   : > { %603 = shalt.err (!%p600_p12)
}
  0x6d   : > { %s604_s7 = scalar_lea.hbm %s870_s15, 128  ;;  %s608_s29 = scalar_lea.hbm %s940_s2, 256 }
  0x6e   : > { %p605_p2 = scmp.ne.s32.totalorder %s870_s15, %s604_s7  ;;  %p609_p9 = scmp.lt.u32.totalorder %s870_s15, %s940_s2 }
  0x6f   : > { %p610_p0 = scmp.lt.u32.totalorder %s608_s29, %s604_s7  ;;  %p612_p13 = scmp.lt.u32.totalorder %s604_s7, %s870_s15 }
  0x70   : > { %p606_p5 = pnand %p605_p2, %p947_p11 }
  0x71   : > { %p611_p10 = por %p610_p0, %p609_p9 }
  0x72   : > { %p607_p8 = pneg %p606_p5 }
  0x73   : > { %p613_p1 = por %p612_p13, %p611_p10 }
  0x75   : > { %p614_p3 = pnand %p613_p1, %p607_p8 }
  0x77   : > { %617 = shalt.err (!%p614_p3)
}
  0x78   : > { %440 = dma.vmem_to_hbm [thread:$0]  (%p947_p11), %s283_s12, 128, %s870_s15, %s252_s3  }
  0x79 PF: > { %s294_s4 = sand.u32 1, %s668_s9   ;;  %p948_p4 = scmp.ne.s32.totalorder %s945_s24, 0 }
  0x7a   : > { %p949_p6 = scmp.ge.s32.totalorder %s688_s14, 2  ;;  %s295_s19 = scalar_lea.sflag [#allocation4], %s294_s4 }
  0x7c   : > { %p448_p7 = pnand %p949_p6, %p948_p4 }
  0x7e   : > { %659 = dma.done.wait (!%p448_p7), %s295_s19, 128  }
  0x7f   : > { %661 = vsyncadd (!%p448_p7), %s295_s19, 4294967168  ;;  %s304_s20 = scalar_lea.sflag [#allocation7], %s294_s4 }
  0x80   : > { %663 = dma.done.wait (!%p448_p7), %s304_s20, 128  }
  0x81   : > { %665 = vsyncadd (!%p448_p7), %s304_s20, 4294967168  ;;  %s22_s14 = sadd.s32 1, %s688_s14   ;;  %s950_s9 = smov %s672_s10 }
  0x82   : > { %p19_p12 = scmp.ge.s32.totalorder %s22_s14, 4   ;;  %s951_s10 = smov %s676_s11 }
  0x83   : > { %s952_s11 = smov %s780_s23  ;;  %s953_s12 = smov %s684_s13 }
  0x84   : > { %s954_s13 = smov %s956_s17  ;;  %21 = sbr.rel (!%p19_p12) target bundleno = 8 (0x8), region = 109 }
  0x8b   :  { %309 = vsyncpa [#allocation3], 1 }
  0x8c   :  { %311 = vsyncpa [#allocation3 + $0x1], 1 }
  0x8d   :  { %312 = vsyncpa [#allocation4], 1 }
  0x8e   :  { %314 = vsyncpa [#allocation4 + $0x1], 1 }
  0x8f   :  { %315 = vsyncpa [#allocation7], 1 }
  0x90   :  { %317 = vsyncpa [#allocation7 + $0x1], 1 }

</bundles_post_ra>
